<compile_context>
chip_gen: v6e
topology: v6e:2x2x1
jax: 0.10.0
libtpu: 0.0.40
codegen_flags: <defaults>
</compile_context>

<pallas_src>
import functools

import jax
import jax.numpy as jnp
from jax.experimental import pallas as pl
from jax.experimental.pallas import tpu as pltpu


DEFAULT_TM = 512
DEFAULT_TN = 512
DEFAULT_TK = 2048


def _round_up(x, m):
    return ((x + m - 1) // m) * m


def _sublane_pack(dtype):
    # Native sublane packing unit: 8 for 4-byte, 16 for 2-byte, 32 for 1-byte.
    return max(8, 32 // jnp.dtype(dtype).itemsize)


def _plan_nk_tiles(din, dout, tn, tk):
    """Shared (init-time padding + forward) plan for the K / N tile sizes."""
    tk_e = max(128, (min(tk, _round_up(din, 128)) // 128) * 128)
    k_p = _round_up(din, tk_e)
    tn_e = max(128, (min(tn, _round_up(dout, 128)) // 128) * 128)
    n_p = _round_up(dout, tn_e)
    return tk_e, k_p, tn_e, n_p


def _w_spec_split_k(block_shape, bufs):
    """W BlockSpec for the K-split path; deeper buffering when available."""
    idx = lambda i, j, k: (k, j)
    if bufs <= 2:
        return pl.BlockSpec(block_shape, idx)
    try:
        return pl.BlockSpec(block_shape, idx, pipeline_mode=pl.Buffered(bufs))
    except (TypeError, AttributeError):
        # Older Pallas without pipeline_mode / Buffered: default double-buffer.
        return pl.BlockSpec(block_shape, idx)


# ----------------------------- kernels --------------------------------------


def _qkv_kernel_fused_k(x_ref, w_ref, b_ref, o_ref):
    # Whole K in one tile: one MXU pass, bias added right before the only store.
    acc = jnp.dot(x_ref[...], w_ref[...], preferred_element_type=jnp.float32)
    o_ref[...] = (acc + b_ref[...].astype(jnp.float32)).astype(o_ref.dtype)


def _qkv_kernel_split_k(x_ref, w_ref, b_ref, o_ref, acc_ref):
    k = pl.program_id(2)

    @pl.when(k == 0)
    def _():
        # Fold the bias into the accumulator init (no epilogue VPU add).
        acc_ref[...] = jnp.broadcast_to(
            b_ref[...].astype(jnp.float32), acc_ref.shape)

    acc_ref[...] += jnp.dot(
        x_ref[...], w_ref[...], preferred_element_type=jnp.float32)

    @pl.when(k == pl.num_programs(2) - 1)
    def _():
        o_ref[...] = acc_ref[...].astype(o_ref.dtype)


# ----------------------------- init-time fusion -----------------------------


def make_qkv_params(wq, bq, wk, bk, wv, bv, *, dtype=None,
                    tn=DEFAULT_TN, tk=DEFAULT_TK):
    """One-time fusion (+ optional bf16 cast) + padding of the three Linears.

    wq/wk/wv : (Dout//3, Din) PyTorch Linear weight layout; bq/bk/bv : (Dout//3,)
    Returns
      w_fused : (K_pad, N_pad) transposed weight, zero-padded to tile multiples
      b_fused : (Dout,)        unpadded bias (carries the true output width)
    Pass dtype=jnp.bfloat16 to hit v6e/v7x MXU rates (accumulation stays f32).
    Row-concat + transpose is mathematically identical to
    torch.concat([q, k, v], dim=-1).
    """
    w_cat = jnp.concatenate([wq, wk, wv], axis=0)      # (Dout, Din)
    b_cat = jnp.concatenate([bq, bk, bv], axis=0)      # (Dout,)
    w_fused = jnp.asarray(w_cat).T                     # (Din, Dout)
    if dtype is not None:
        w_fused = w_fused.astype(dtype)
    din, dout = w_fused.shape
    _, k_p, _, n_p = _plan_nk_tiles(din, dout, tn, tk)
    if (k_p, n_p) != (din, dout):
        w_fused = jnp.pad(w_fused, ((0, k_p - din), (0, n_p - dout)))
    return w_fused, jnp.asarray(b_cat)


# ----------------------------- forward --------------------------------------


@functools.partial(jax.jit, static_argnames=("tm", "tn", "tk"))
def qkv_layer(x, w_fused, b_fused, *, tm=DEFAULT_TM, tn=DEFAULT_TN, tk=DEFAULT_TK):
    """Equivalent of QKV_layer.forward.

    x        : (..., Din)
    w_fused  : (K_pad, N_pad) from make_qkv_params (optionally bf16)
    b_fused  : (Dout,)        unpadded bias from make_qkv_params
    returns  : (..., Dout)    in x's original dtype
    """
    lead_shape = x.shape[:-1]
    din = x.shape[-1]
    dout = b_fused.shape[0]          # true output width (bias is unpadded)
    out_dtype = x.dtype

    # Match compute dtype to the (possibly bf16) fused weight.
    compute_dtype = w_fused.dtype
    if x.dtype != compute_dtype:
        x = x.astype(compute_dtype)

    m = 1
    for s in lead_shape:
        m *= s
    x2d = x.reshape(m, din)

    # ---- tile plan (same algorithm make_qkv_params used to pad W) ----------
    tk_e, k_p, tn_e, n_p = _plan_nk_tiles(din, dout, tn, tk)
    k_w, n_w = w_fused.shape
    k_p = max(k_p, _round_up(k_w, tk_e))   # honor pre-padded weights
    n_p = max(n_p, _round_up(n_w, tn_e))

    pack = _sublane_pack(compute_dtype)
    tm_e = max(pack, min(tm, _round_up(m, pack)))
    m_p = _round_up(m, tm_e)

    # v7x megacore: with a single M block, make sure the N axis has >= 2
    # blocks so both TensorCores get work (no-op on v5e/v6e correctness-wise).
    if m_p // tm_e == 1 and n_p // tn_e < 2 and n_p >= 256:
        units = n_p // 128
        for u in range(units // 2, 0, -1):
            if units % u == 0:
                tn_e = u * 128
                break

    m_blocks = m_p // tm_e
    n_blocks = n_p // tn_e
    k_blocks = k_p // tk_e

    # ---- padding (weight pad is a no-op when produced by make_qkv_params) --
    if (m_p, k_p) != (m, din):
        x2d = jnp.pad(x2d, ((0, m_p - m), (0, k_p - din)))
    w2d = w_fused
    if (k_w, n_w) != (k_p, n_p):
        w2d = jnp.pad(w2d, ((0, k_p - k_w), (0, n_p - n_w)))
    # Keep the bias in f32 (tiny) so bf16 weight paths don't round it.
    b2d = b_fused.reshape(1, dout).astype(jnp.float32)
    if n_p != dout:
        b2d = jnp.pad(b2d, ((0, 0), (0, n_p - dout)))

    itemsize = jnp.dtype(compute_dtype).itemsize
    out_itemsize = jnp.dtype(out_dtype).itemsize

    # Advisory cost: account for re-streaming x per N block and W per M block.
    cost = pl.CostEstimate(
        flops=2 * m_p * k_p * n_p,
        transcendentals=0,
        bytes_accessed=(
            m_p * k_p * itemsize * n_blocks
            + k_p * n_p * itemsize * m_blocks
            + n_p * 4 * m_blocks
            + m_p * n_p * out_itemsize
        ),
    )

    if k_blocks == 1:
        # Din fits one tile: no accumulator, no revisit, fully parallel grid.
        kernel = _qkv_kernel_fused_k
        grid = (m_blocks, n_blocks)
        in_specs = [
            pl.BlockSpec((tm_e, tk_e), lambda i, j: (i, 0)),
            pl.BlockSpec((tk_e, tn_e), lambda i, j: (0, j)),
            pl.BlockSpec((1, tn_e), lambda i, j: (0, j)),
        ]
        out_specs = pl.BlockSpec((tm_e, tn_e), lambda i, j: (i, j))
        scratch_shapes = []
        dim_sem = ("parallel", "parallel")
        w_bufs = 2
        acc_bytes = 0
    else:
        kernel = _qkv_kernel_split_k
        grid = (m_blocks, n_blocks, k_blocks)
        w_bufs = 3 if k_blocks >= 3 else 2
        in_specs = [
            pl.BlockSpec((tm_e, tk_e), lambda i, j, k: (i, k)),
            _w_spec_split_k((tk_e, tn_e), w_bufs),
            pl.BlockSpec((1, tn_e), lambda i, j, k: (0, j)),
        ]
        out_specs = pl.BlockSpec((tm_e, tn_e), lambda i, j, k: (i, j))
        scratch_shapes = [pltpu.VMEM((tm_e, tn_e), jnp.float32)]
        dim_sem = ("parallel", "parallel", "arbitrary")
        acc_bytes = tm_e * tn_e * 4

    # Explicit scoped-VMEM budget sized from the actual tile footprint,
    # capped to stay safe on v7x's 64 MiB physical VMEM.
    footprint = (
        2 * tm_e * tk_e * itemsize          # x double-buffer
        + w_bufs * tk_e * tn_e * itemsize   # W buffers
        + 2 * tm_e * tn_e * out_itemsize    # output double-buffer
        + 2 * tn_e * 4                      # bias
        + acc_bytes
    )
    vmem_limit = int(min(60 * (1 << 20), max(32 * (1 << 20), footprint * 3 // 2)))

    out2d = pl.pallas_call(
        kernel,
        out_shape=jax.ShapeDtypeStruct((m_p, n_p), out_dtype),
        grid_spec=pltpu.PrefetchScalarGridSpec(
            num_scalar_prefetch=0,
            grid=grid,
            in_specs=in_specs,
            out_specs=out_specs,
            scratch_shapes=scratch_shapes,
        ),
        compiler_params=pltpu.CompilerParams(
            dimension_semantics=dim_sem,
            vmem_limit_bytes=vmem_limit,
        ),
        cost_estimate=cost,
    )(x2d, w2d, b2d)

    out2d = out2d[:m, :dout]
    return out2d.reshape(*lead_shape, dout)


# ----------------------------- demo / self-test -----------------------------


def _init_linear(key, out_f, in_f):
    # Deterministic init mimicking torch.nn.Linear (uniform in +/- 1/sqrt(in_f)).
    kw, kb = jax.random.split(key)
    bound = 1.0 / jnp.sqrt(jnp.float32(in_f))
    w = jax.random.uniform(kw, (out_f, in_f), jnp.float32, -bound, bound)
    b = jax.random.uniform(kb, (out_f,), jnp.float32, -bound, bound)
    return w, b


if __name__ == "__main__":
    key = jax.random.PRNGKey(0)

    # --- Test 1: small module-sized shapes (single-K fused kernel path) -----
    batch, seq, in_features, out_features = 2, 8, 32, 48
    kx, kq, kk, kv = jax.random.split(key, 4)
    x = jax.random.normal(kx, (batch, seq, in_features), jnp.float32)
    wq, bq = _init_linear(kq, out_features // 3, in_features)
    wk, bk = _init_linear(kk, out_features // 3, in_features)
    wv, bv = _init_linear(kv, out_features // 3, in_features)

    w_fused, b_fused = make_qkv_params(wq, bq, wk, bk, wv, bv)
    out = jax.block_until_ready(qkv_layer(x, w_fused, b_fused))

    ref = jnp.concatenate(
        [x @ wq.T + bq, x @ wk.T + bk, x @ wv.T + bv], axis=-1)
    assert out.shape == (batch, seq, out_features), out.shape
    assert jnp.allclose(out, ref, atol=1e-5, rtol=1e-5), "mismatch (fused-K path)"

    # --- Test 2: small shapes that force the K-split accumulator path -------
    b2, s2, din2, dout2 = 2, 64, 512, 384
    k2 = jax.random.PRNGKey(1)
    kx2, kq2, kk2, kv2 = jax.random.split(k2, 4)
    x2 = jax.random.normal(kx2, (b2, s2, din2), jnp.float32)
    wq2, bq2 = _init_linear(kq2, dout2 // 3, din2)
    wk2, bk2 = _init_linear(kk2, dout2 // 3, din2)
    wv2, bv2 = _init_linear(kv2, dout2 // 3, din2)
    wf2, bf2 = make_qkv_params(wq2, bq2, wk2, bk2, wv2, bv2, tn=128, tk=128)
    out2 = jax.block_until_ready(
        qkv_layer(x2, wf2, bf2, tm=128, tn=128, tk=128))
    ref2 = jnp.concatenate(
        [x2 @ wq2.T + bq2, x2 @ wk2.T + bk2, x2 @ wv2.T + bv2], axis=-1)
    assert out2.shape == (b2, s2, dout2), out2.shape
    assert jnp.allclose(out2, ref2, atol=2e-3, rtol=2e-3), "mismatch (K-split path)"

    print("KERNEL_OK")
</pallas_src>

<mosaic_0001>
module attributes {stable_mosaic.version = 11 : i64} {
  func.func @_qkv_kernel_fused_k(%arg0: i32, %arg1: i32, %arg2: memref<16x128xf32, #tpu.memory_space<vmem>>, %arg3: memref<128x128xf32, #tpu.memory_space<vmem>>, %arg4: memref<1x128xf32, #tpu.memory_space<vmem>>, %arg5: memref<16x128xf32, #tpu.memory_space<vmem>>) attributes {dimension_semantics = [#tpu.dimension_semantics<parallel>, #tpu.dimension_semantics<parallel>], iteration_bounds = array<i64: 1, 1>, scalar_prefetch = 0 : i64, scratch_operands = 0 : i64, tpu.core_type = #tpu.core_type<tc>, window_params = [{transform_indices = @transform_0, window_bounds = array<i64: 16, 128>}, {transform_indices = @transform_1, window_bounds = array<i64: 128, 128>}, {transform_indices = @transform_2, window_bounds = array<i64: 1, 128>}, {transform_indices = @transform_3, window_bounds = array<i64: 16, 128>}]} {
    %c0 = arith.constant 0 : index
    %c0_0 = arith.constant 0 : index
    %0 = vector.load %arg2[%c0, %c0_0] : memref<16x128xf32, #tpu.memory_space<vmem>>, vector<16x128xf32>
    %c0_1 = arith.constant 0 : index
    %c0_2 = arith.constant 0 : index
    %1 = vector.load %arg3[%c0_1, %c0_2] : memref<128x128xf32, #tpu.memory_space<vmem>>, vector<128x128xf32>
    %cst = arith.constant dense<0.000000e+00> : vector<16x128xf32>
    %2 = tpu.matmul %0, %1, %cst {dimension_numbers = #tpu.dot_dimension_numbers<[1], [0], [0], [1], [0, 0, 1, 1], [], []>} : vector<16x128xf32>, vector<128x128xf32>, vector<16x128xf32> -> vector<16x128xf32>
    %c0_3 = arith.constant 0 : index
    %c0_4 = arith.constant 0 : index
    %3 = vector.load %arg4[%c0_3, %c0_4] : memref<1x128xf32, #tpu.memory_space<vmem>>, vector<1x128xf32>
    %4 = vector.broadcast %3 : vector<1x128xf32> to vector<16x128xf32>
    %5 = arith.addf %2, %4 : vector<16x128xf32>
    %c0_5 = arith.constant 0 : index
    %c0_6 = arith.constant 0 : index
    %6 = vector.load %arg5[%c0_5, %c0_6] : memref<16x128xf32, #tpu.memory_space<vmem>>, vector<16x128xf32>
    tpu.vector_store %arg5[%c0_5, %c0_6], %5 {strides = array<i32>} : memref<16x128xf32, #tpu.memory_space<vmem>>, vector<16x128xf32>,
    return
  }
  func.func @transform_0(%arg0: i32, %arg1: i32) -> (i32, i32) {
    %c0_i32 = arith.constant 0 : i32
    %c0_i32_0 = arith.constant 0 : i32
    return %arg0, %c0_i32 : i32, i32
  }
  func.func @transform_1(%arg0: i32, %arg1: i32) -> (i32, i32) {
    %c0_i32 = arith.constant 0 : i32
    %c0_i32_0 = arith.constant 0 : i32
    return %c0_i32, %arg1 : i32, i32
  }
  func.func @transform_2(%arg0: i32, %arg1: i32) -> (i32, i32) {
    %c0_i32 = arith.constant 0 : i32
    %c0_i32_0 = arith.constant 0 : i32
    return %c0_i32, %arg1 : i32, i32
  }
  func.func @transform_3(%arg0: i32, %arg1: i32) -> (i32, i32) {
    %c0_i32 = arith.constant 0 : i32
    return %arg0, %arg1 : i32, i32
  }
}

</mosaic_0001>

<bundles_post_ra>
// kernel: qkv_layer.1
= control target key start
LH: loop header
LB: loop body
LE: loop exit
PB: predicated region body
PF: predicated region fallthrough
CT: control target
= control target key end

     0   :  { %8 = vsyncpa [#allocation3], 0  ;;  %s214_s12 = smov [#allocation2]   ;;  %s255_s0 = inlined_call_operand.vmem [shape: f32[16,128], index: 0, kind: input, shape index: {}]   ;;  %s256_s1 = inlined_call_operand.hbm [shape: f32[128,128], index: 1, kind: input, shape index: {}]   ;;  %s257_s2 = inlined_call_operand.vmem [shape: f32[1,128], index: 2, kind: input, shape index: {}]   ;;  %s258_s3 = inlined_call_operand.vmem [shape: f32[16,128], index: 3, kind: output, shape index: {}]  }
   0x1   :  { %s16_s13 = sshll.u32 %s214_s12, 4  ;;  %s17_s13 = int_to_ptr.vmem [resolvable:$true] %s16_s13 }
   0x2   :  { %s200_s14 = scalar_lea.vmem %s17_s13, 2048  ;;  %p205_p1 = scmp.lt.s32.totalorder %s17_s13, %s17_s13 }
   0x3   :  { %p201_p0 = scmp.ne.s32.totalorder %s17_s13, %s200_s14  ;;  %p206_p2 = scmp.lt.s32.totalorder %s200_s14, %s200_s14 }
   0x5   :  { %p207_p3 = por %p206_p2, %p205_p1 }
   0x7   :  { %p208_p4 = pnand %p207_p3, %p201_p0 }
   0x9   :  { %211 = shalt.err (!%p208_p4)
}
   0xa   :  { %s215_s15 = smov 128   ;;  %s216_s16 = smov 8  }
   0xb   :  { %22 = dma.hbm_to_vmem [thread:$0]  %s256_s1, 2048, %s17_s13, [#allocation3], %s215_s15, %s215_s15, %s216_s16  }
   0xc   :  { %212 = dma.done.wait [#allocation3], 2048  }
   0xd   :  { %213 = vsyncadd [#allocation3], 4294965248  ;;  %v45_v0 = vld [vmem:[#allocation2 + $0x78] sm:$0xff]  ;;  %v44_v1 = vld [vmem:[#allocation2 + $0x70] sm:$0xff] }
   0xe   :  { %154 = vmatprep.subr.mxu0 %v45_v0  ;;  %v43_v2 = vld [vmem:[#allocation2 + $0x68] sm:$0xff]  ;;  %v42_v3 = vld [vmem:[#allocation2 + $0x60] sm:$0xff]  ;;  %v41_v5 = vld [vmem:[#allocation2 + $0x58] sm:$0xff] }
   0xf   :  { %155 = vmatpush3.msra.mxu0 %v45_v0  ;;  %v28_v4 = vld [vmem:[%s255_s0] sm:$0xff]  ;;  %v40_v6 = vld [vmem:[#allocation2 + $0x50] sm:$0xff]  ;;  %v39_v7 = vld [vmem:[#allocation2 + $0x48] sm:$0xff] }
  0x10   :  { %156 = vmatprep.subr.mxu0 %v44_v1  ;;  %186 = vmatprep.mubr.f32.mxu0 %v28_v4  ;;  %v38_v8 = vld [vmem:[#allocation2 + $0x40] sm:$0xff]  ;;  %v37_v9 = vld [vmem:[#allocation2 + $0x38] sm:$0xff]  ;;  %v36_v10 = vld [vmem:[#allocation2 + $0x30] sm:$0xff] }
  0x11   :  { %157 = vmatpush3.msra.mxu0 %v44_v1  ;;  %v35_v11 = vld [vmem:[#allocation2 + $0x28] sm:$0xff]  ;;  %v34_v12 = vld [vmem:[#allocation2 + $0x20] sm:$0xff]  ;;  %v33_v13 = vld [vmem:[#allocation2 + $0x18] sm:$0xff] }
  0x12   :  { %158 = vmatprep.subr.mxu0 %v43_v2  ;;  %v32_v14 = vld [vmem:[#allocation2 + $0x10] sm:$0xff]  ;;  %v31_v15 = vld [vmem:[#allocation2 + $0x8] sm:$0xff]  ;;  %v30_v16 = vld [vmem:[#allocation2] sm:$0xff] }
  0x13   :  { %159 = vmatpush3.msra.mxu0 %v43_v2  ;;  %v29_v17 = vld [vmem:[%s255_s0 + $0x8] sm:$0xff]  ;;  %v135_v18 = vld [vmem:[%s257_s2] ss:$0 sm:$0xff] }
  0x14   :  { %160 = vmatprep.subr.mxu0 %v42_v3 }
  0x15   :  { %161 = vmatpush3.msra.mxu0 %v42_v3 }
  0x16   :  { %162 = vmatprep.subr.mxu0 %v41_v5 }
  0x17   :  { %163 = vmatpush3.msra.mxu0 %v41_v5 }
  0x18   :  { %164 = vmatprep.subr.mxu0 %v40_v6 }
  0x19   :  { %165 = vmatpush3.msra.mxu0 %v40_v6 }
  0x1a   :  { %166 = vmatprep.subr.mxu0 %v39_v7 }
  0x1b   :  { %167 = vmatpush3.msra.mxu0 %v39_v7 }
  0x1c   :  { %168 = vmatprep.subr.mxu0 %v38_v8 }
  0x1d   :  { %169 = vmatpush3.msra.mxu0 %v38_v8 }
  0x1e   :  { %170 = vmatprep.subr.mxu0 %v37_v9 }
  0x1f   :  { %171 = vmatpush3.msra.mxu0 %v37_v9 }
  0x20   :  { %172 = vmatprep.subr.mxu0 %v36_v10 }
  0x21   :  { %173 = vmatpush3.msra.mxu0 %v36_v10 }
  0x22   :  { %174 = vmatprep.subr.mxu0 %v35_v11 }
  0x23   :  { %175 = vmatpush3.msra.mxu0 %v35_v11 }
  0x24   :  { %176 = vmatprep.subr.mxu0 %v34_v12 }
  0x25   :  { %177 = vmatpush3.msra.mxu0 %v34_v12 }
  0x26   :  { %178 = vmatprep.subr.mxu0 %v33_v13 }
  0x27   :  { %179 = vmatpush3.msra.mxu0 %v33_v13 }
  0x28   :  { %180 = vmatprep.subr.mxu0 %v32_v14 }
  0x29   :  { %181 = vmatpush3.msra.mxu0 %v32_v14 }
  0x2a   :  { %182 = vmatprep.subr.mxu0 %v31_v15 }
  0x2b   :  { %183 = vmatpush3.msra.mxu0 %v31_v15 }
  0x2c   :  { %184 = vmatprep.subr.mxu0 %v30_v16 }
  0x2d   :  { %185 = vmatpush3.msra.mxu0 %v30_v16 }
  0x2e   :  { %187 = vmatmul.mubr.f32.vlgmr.msra.gmra.mxu0 %v29_v17 }
  0xee   :  { %v188_v19 = vpop.f32.mrf.mxu0 }
  0xef   :  { %v125_v20 = vadd.f32 %v188_v19, %v135_v18 }
  0xf0   :  { %v119_v21 = vpop.f32.mrf.mxu0 }
  0xf1   :  { %129 = vst [vmem:[%s258_s3 + $0x8] sm:$0xff] %v125_v20  ;;  %v120_v22 = vadd.f32 %v135_v18, %v119_v21 }
  0xf3   :  { %128 = vst [vmem:[%s258_s3] sm:$0xff] %v120_v22 }
  0xf4   :  { %134 = vsyncpa [#allocation3], 1 }

</bundles_post_ra>
